<compile_context>
chip_gen: v6e
topology: v6e:2x2x1
jax: 0.10.0
libtpu: 0.0.40
codegen_flags: <defaults>
</compile_context>

<pallas_src>
import functools

import jax
import jax.numpy as jnp
from jax.experimental import pallas as pl
from jax.experimental.pallas import tpu as pltpu

LAYER_SIZES = [2, 100, 100, 100, 100, 6]  # input, 4 hidden, output
PAD = 128                                 # lane-dense padded width


def _round_up(x, m):
    return ((x + m - 1) // m) * m


def _mlp_kernel(x_ref, w_ref, b_ref, o_ref, *, n_layers, mxu_dtype, half):
    """One batch tile: full n_layers MLP in VMEM.

    x_ref: [TB, 128]  (valid lanes [:2], rest zero)
    w_ref: [n_layers, 128, 128]   zero-padded, dtype = mxu_dtype
    b_ref: [n_layers, 1, 128]     zero-padded, float32
    o_ref: [TB, 128]              valid lanes [:6]
    half : TB//2 (interleave two row-half streams) or None (single stream).
    """
    if half is not None:
        # Two independent row-half chains, interleaved so the MXU work of one
        # half overlaps the EUP (tanh) work of the other.
        ha = x_ref[pl.ds(0, half), :].astype(mxu_dtype)
        hb = x_ref[pl.ds(half, half), :].astype(mxu_dtype)
        for i in range(n_layers):
            wi = w_ref[i]
            bi = b_ref[i]
            za = jnp.dot(ha, wi, preferred_element_type=jnp.float32) + bi
            zb = jnp.dot(hb, wi, preferred_element_type=jnp.float32) + bi
            if i < n_layers - 1:
                ha = jnp.tanh(za).astype(mxu_dtype)
                hb = jnp.tanh(zb).astype(mxu_dtype)
            else:
                ha, hb = za, zb
        o_ref[pl.ds(0, half), :] = ha.astype(o_ref.dtype)
        o_ref[pl.ds(half, half), :] = hb.astype(o_ref.dtype)
    else:
        h = x_ref[...].astype(mxu_dtype)
        for i in range(n_layers - 1):
            z = jnp.dot(h, w_ref[i], preferred_element_type=jnp.float32) + b_ref[i]
            h = jnp.tanh(z).astype(mxu_dtype)
        out = (jnp.dot(h, w_ref[n_layers - 1],
                       preferred_element_type=jnp.float32) + b_ref[n_layers - 1])
        o_ref[...] = out.astype(o_ref.dtype)


def pack_params(params, w_dtype=jnp.float32):
    """Pack (W:[in,out], b:[1,out]) pairs into zero-padded [L,128,128]/[L,1,128].

    Padded entries MUST be exactly zero (see invariant at top of file).
    Biases stay f32 so adds/tanh run in f32 even when the MXU feed is bf16.
    """
    n = len(params)
    W = jnp.zeros((n, PAD, PAD), w_dtype)
    B = jnp.zeros((n, 1, PAD), jnp.float32)
    for i, (w, b) in enumerate(params):
        fi, fo = w.shape
        assert fi <= PAD and fo <= PAD, "layer width exceeds 128-lane padding"
        W = W.at[i, :fi, :fo].set(jnp.asarray(w, w_dtype))
        B = B.at[i, :, :fo].set(jnp.asarray(b, jnp.float32).reshape(1, fo))
    return W, B


def make_mlp_forward(params, *, batch_tile=None, mxu_dtype=jnp.float32):
    """Packs parameters ONCE and returns a jitted fused-MLP forward.

    Args:
      params: list of (W, b) with W: [in, out], b: [1, out] (unpadded f32).
      batch_tile: rows per grid step (None -> auto, capped at 512).
      mxu_dtype: dtype fed to the MXU. jnp.bfloat16 on v6e/v7x cuts MXU passes
        ~3x and halves weight DMA (expect ~1e-3 rel error); f32 accumulation,
        bias adds and tanh remain f32 either way.
    """
    in_features = params[0][0].shape[0]
    out_features = params[-1][0].shape[1]
    n_layers = len(params)
    W, B = pack_params(params, w_dtype=mxu_dtype)   # hoisted: device-resident

    def _forward(x):
        batch = x.shape[0]

        bt = batch_tile
        if bt is None:
            # >=2 grid steps (feeds both TCs on v7x), capped at 512 so large
            # batches get several steps per core for steady-state pipelining.
            bt = min(512, max(16, _round_up(pl.cdiv(batch, 2), 16)))
        bt = max(8, _round_up(min(bt, _round_up(batch, 8)), 8))
        half = bt // 2 if (bt >= 16 and bt % 16 == 0) else None

        # Lane-dense x: pad features 2 -> 128 so layer 1 is a plain 128x128
        # MXU pass and the x DMA is a proper (8,128)-aligned tile.
        x128 = jnp.pad(x.astype(jnp.float32),
                       ((0, 0), (0, PAD - in_features)))

        kernel = functools.partial(_mlp_kernel, n_layers=n_layers,
                                   mxu_dtype=mxu_dtype, half=half)

        # TODO(synk): only 6/128 output lanes are useful; an 8-lane (masked
        # vst) or bf16 output block would cut writeback ~16x at large batch —
        # keep lane-dense store until a trace confirms the masked store wins.
        out = pl.pallas_call(
            kernel,
            out_shape=jax.ShapeDtypeStruct((batch, PAD), jnp.float32),
            grid_spec=pl.GridSpec(
                grid=(pl.cdiv(batch, bt),),   # ragged last block handled by Pallas
                in_specs=[
                    pl.BlockSpec((bt, PAD), lambda i: (i, 0)),
                    # Constant index maps -> weights/biases stay VMEM-resident
                    # across grid steps (no per-step 320 KiB re-DMA).
                    pl.BlockSpec((n_layers, PAD, PAD), lambda i: (0, 0, 0)),
                    pl.BlockSpec((n_layers, 1, PAD), lambda i: (0, 0, 0)),
                ],
                out_specs=pl.BlockSpec((bt, PAD), lambda i: (i, 0)),
            ),
            compiler_params=pltpu.CompilerParams(
                dimension_semantics=("parallel",)),
        )(x128, W, B)

        return out[:, :out_features]

    return jax.jit(_forward)


def init_params(key, layer_sizes):
    """Deterministic init mimicking PyTorch nn.Linear default U[-1/sqrt(fan_in), +]."""
    params = []
    for fan_in, fan_out in zip(layer_sizes[:-1], layer_sizes[1:]):
        key, wk, bk = jax.random.split(key, 3)
        bound = 1.0 / jnp.sqrt(jnp.float32(fan_in))
        w = jax.random.uniform(wk, (fan_in, fan_out), jnp.float32, -bound, bound)
        b = jax.random.uniform(bk, (1, fan_out), jnp.float32, -bound, bound)
        params.append((w, b))
    return params


def mlp_reference(x, params):
    """Plain-JAX reference (matches the PyTorch module's forward); pinned precision."""
    hi = jax.lax.Precision.HIGHEST
    h = x
    for (w, b) in params[:-1]:
        h = jnp.tanh(jnp.dot(h, w, precision=hi) + b)
    w, b = params[-1]
    return jnp.dot(h, w, precision=hi) + b


if __name__ == "__main__":
    key = jax.random.PRNGKey(0)
    pkey, xkey = jax.random.split(key)

    params = init_params(pkey, LAYER_SIZES)

    batch = 256
    x = jax.random.normal(xkey, (batch, LAYER_SIZES[0]), jnp.float32)
    ref = mlp_reference(x, params)

    # f32 MXU path (default, works on all generations).
    fwd = make_mlp_forward(params)
    out = jax.block_until_ready(fwd(x))
    assert out.shape == (batch, LAYER_SIZES[-1])
    assert jnp.allclose(out, ref, atol=1e-4, rtol=1e-4), "f32 mismatch vs reference"

    # Ragged batch: no wrapper-side padding; Pallas masks the last block.
    x_odd = x[:200]
    out_odd = jax.block_until_ready(fwd(x_odd))
    assert jnp.allclose(out_odd, mlp_reference(x_odd, params),
                        atol=1e-4, rtol=1e-4), "ragged-batch mismatch"

    # bf16-fed MXU (v6e/v7x fast path): f32 accumulation, looser tolerance.
    fwd_bf16 = make_mlp_forward(params, mxu_dtype=jnp.bfloat16)
    out_bf16 = jax.block_until_ready(fwd_bf16(x))
    assert jnp.allclose(out_bf16, ref, atol=5e-2, rtol=5e-2), "bf16 mismatch"

    print("KERNEL_OK")
</pallas_src>

<mosaic_0001>
module attributes {stable_mosaic.version = 11 : i64} {
  func.func @_mlp_kernel(%arg0: i32, %arg1: memref<128x128xf32, #tpu.memory_space<vmem>>, %arg2: memref<5x128x128xf32, #tpu.memory_space<vmem>>, %arg3: memref<5x1x128xf32, #tpu.memory_space<vmem>>, %arg4: memref<128x128xf32, #tpu.memory_space<vmem>>) attributes {dimension_semantics = [#tpu.dimension_semantics<parallel>], iteration_bounds = array<i64: 2>, scalar_prefetch = 0 : i64, scratch_operands = 0 : i64, tpu.core_type = #tpu.core_type<tc>, window_params = [{transform_indices = @transform_0, window_bounds = array<i64: 128, 128>}, {pipeline_mode = #tpu.pipeline_mode<synchronous>, transform_indices = @transform_1, window_bounds = array<i64: 5, 128, 128>}, {pipeline_mode = #tpu.pipeline_mode<synchronous>, transform_indices = @transform_2, window_bounds = array<i64: 5, 1, 128>}, {transform_indices = @transform_3, window_bounds = array<i64: 128, 128>}]} {
    %c0 = arith.constant 0 : index
    %c0_0 = arith.constant 0 : index
    %0 = vector.load %arg1[%c0, %c0_0] : memref<128x128xf32, #tpu.memory_space<vmem>>, vector<64x128xf32>
    %c64 = arith.constant 64 : index
    %c0_1 = arith.constant 0 : index
    %1 = vector.load %arg1[%c64, %c0_1] : memref<128x128xf32, #tpu.memory_space<vmem>>, vector<64x128xf32>
    %c0_2 = arith.constant 0 : index
    %c0_3 = arith.constant 0 : index
    %c0_4 = arith.constant 0 : index
    %2 = vector.load %arg2[%c0_2, %c0_3, %c0_4] : memref<5x128x128xf32, #tpu.memory_space<vmem>>, vector<1x128x128xf32>
    %3 = vector.shape_cast %2 : vector<1x128x128xf32> to vector<128x128xf32>
    %c0_5 = arith.constant 0 : index
    %c0_6 = arith.constant 0 : index
    %c0_7 = arith.constant 0 : index
    %4 = vector.load %arg3[%c0_5, %c0_6, %c0_7] : memref<5x1x128xf32, #tpu.memory_space<vmem>>, vector<1x1x128xf32>
    %5 = vector.shape_cast %4 : vector<1x1x128xf32> to vector<1x128xf32>
    %cst = arith.constant dense<0.000000e+00> : vector<64x128xf32>
    %6 = tpu.matmul %0, %3, %cst {dimension_numbers = #tpu.dot_dimension_numbers<[1], [0], [0], [1], [0, 0, 1, 1], [], []>} : vector<64x128xf32>, vector<128x128xf32>, vector<64x128xf32> -> vector<64x128xf32>
    %7 = vector.broadcast %5 : vector<1x128xf32> to vector<64x128xf32>
    %8 = arith.addf %6, %7 : vector<64x128xf32>
    %cst_8 = arith.constant dense<0.000000e+00> : vector<64x128xf32>
    %9 = tpu.matmul %1, %3, %cst_8 {dimension_numbers = #tpu.dot_dimension_numbers<[1], [0], [0], [1], [0, 0, 1, 1], [], []>} : vector<64x128xf32>, vector<128x128xf32>, vector<64x128xf32> -> vector<64x128xf32>
    %10 = vector.broadcast %5 : vector<1x128xf32> to vector<64x128xf32>
    %11 = arith.addf %9, %10 : vector<64x128xf32>
    %12 = math.tanh %8 : vector<64x128xf32>
    %13 = math.tanh %11 : vector<64x128xf32>
    %c1 = arith.constant 1 : index
    %c0_9 = arith.constant 0 : index
    %c0_10 = arith.constant 0 : index
    %14 = vector.load %arg2[%c1, %c0_9, %c0_10] : memref<5x128x128xf32, #tpu.memory_space<vmem>>, vector<1x128x128xf32>
    %15 = vector.shape_cast %14 : vector<1x128x128xf32> to vector<128x128xf32>
    %c1_11 = arith.constant 1 : index
    %c0_12 = arith.constant 0 : index
    %c0_13 = arith.constant 0 : index
    %16 = vector.load %arg3[%c1_11, %c0_12, %c0_13] : memref<5x1x128xf32, #tpu.memory_space<vmem>>, vector<1x1x128xf32>
    %17 = vector.shape_cast %16 : vector<1x1x128xf32> to vector<1x128xf32>
    %cst_14 = arith.constant dense<0.000000e+00> : vector<64x128xf32>
    %18 = tpu.matmul %12, %15, %cst_14 {dimension_numbers = #tpu.dot_dimension_numbers<[1], [0], [0], [1], [0, 0, 1, 1], [], []>} : vector<64x128xf32>, vector<128x128xf32>, vector<64x128xf32> -> vector<64x128xf32>
    %19 = vector.broadcast %17 : vector<1x128xf32> to vector<64x128xf32>
    %20 = arith.addf %18, %19 : vector<64x128xf32>
    %cst_15 = arith.constant dense<0.000000e+00> : vector<64x128xf32>
    %21 = tpu.matmul %13, %15, %cst_15 {dimension_numbers = #tpu.dot_dimension_numbers<[1], [0], [0], [1], [0, 0, 1, 1], [], []>} : vector<64x128xf32>, vector<128x128xf32>, vector<64x128xf32> -> vector<64x128xf32>
    %22 = vector.broadcast %17 : vector<1x128xf32> to vector<64x128xf32>
    %23 = arith.addf %21, %22 : vector<64x128xf32>
    %24 = math.tanh %20 : vector<64x128xf32>
    %25 = math.tanh %23 : vector<64x128xf32>
    %c2 = arith.constant 2 : index
    %c0_16 = arith.constant 0 : index
    %c0_17 = arith.constant 0 : index
    %26 = vector.load %arg2[%c2, %c0_16, %c0_17] : memref<5x128x128xf32, #tpu.memory_space<vmem>>, vector<1x128x128xf32>
    %27 = vector.shape_cast %26 : vector<1x128x128xf32> to vector<128x128xf32>
    %c2_18 = arith.constant 2 : index
    %c0_19 = arith.constant 0 : index
    %c0_20 = arith.constant 0 : index
    %28 = vector.load %arg3[%c2_18, %c0_19, %c0_20] : memref<5x1x128xf32, #tpu.memory_space<vmem>>, vector<1x1x128xf32>
    %29 = vector.shape_cast %28 : vector<1x1x128xf32> to vector<1x128xf32>
    %cst_21 = arith.constant dense<0.000000e+00> : vector<64x128xf32>
    %30 = tpu.matmul %24, %27, %cst_21 {dimension_numbers = #tpu.dot_dimension_numbers<[1], [0], [0], [1], [0, 0, 1, 1], [], []>} : vector<64x128xf32>, vector<128x128xf32>, vector<64x128xf32> -> vector<64x128xf32>
    %31 = vector.broadcast %29 : vector<1x128xf32> to vector<64x128xf32>
    %32 = arith.addf %30, %31 : vector<64x128xf32>
    %cst_22 = arith.constant dense<0.000000e+00> : vector<64x128xf32>
    %33 = tpu.matmul %25, %27, %cst_22 {dimension_numbers = #tpu.dot_dimension_numbers<[1], [0], [0], [1], [0, 0, 1, 1], [], []>} : vector<64x128xf32>, vector<128x128xf32>, vector<64x128xf32> -> vector<64x128xf32>
    %34 = vector.broadcast %29 : vector<1x128xf32> to vector<64x128xf32>
    %35 = arith.addf %33, %34 : vector<64x128xf32>
    %36 = math.tanh %32 : vector<64x128xf32>
    %37 = math.tanh %35 : vector<64x128xf32>
    %c3 = arith.constant 3 : index
    %c0_23 = arith.constant 0 : index
    %c0_24 = arith.constant 0 : index
    %38 = vector.load %arg2[%c3, %c0_23, %c0_24] : memref<5x128x128xf32, #tpu.memory_space<vmem>>, vector<1x128x128xf32>
    %39 = vector.shape_cast %38 : vector<1x128x128xf32> to vector<128x128xf32>
    %c3_25 = arith.constant 3 : index
    %c0_26 = arith.constant 0 : index
    %c0_27 = arith.constant 0 : index
    %40 = vector.load %arg3[%c3_25, %c0_26, %c0_27] : memref<5x1x128xf32, #tpu.memory_space<vmem>>, vector<1x1x128xf32>
    %41 = vector.shape_cast %40 : vector<1x1x128xf32> to vector<1x128xf32>
    %cst_28 = arith.constant dense<0.000000e+00> : vector<64x128xf32>
    %42 = tpu.matmul %36, %39, %cst_28 {dimension_numbers = #tpu.dot_dimension_numbers<[1], [0], [0], [1], [0, 0, 1, 1], [], []>} : vector<64x128xf32>, vector<128x128xf32>, vector<64x128xf32> -> vector<64x128xf32>
    %43 = vector.broadcast %41 : vector<1x128xf32> to vector<64x128xf32>
    %44 = arith.addf %42, %43 : vector<64x128xf32>
    %cst_29 = arith.constant dense<0.000000e+00> : vector<64x128xf32>
    %45 = tpu.matmul %37, %39, %cst_29 {dimension_numbers = #tpu.dot_dimension_numbers<[1], [0], [0], [1], [0, 0, 1, 1], [], []>} : vector<64x128xf32>, vector<128x128xf32>, vector<64x128xf32> -> vector<64x128xf32>
    %46 = vector.broadcast %41 : vector<1x128xf32> to vector<64x128xf32>
    %47 = arith.addf %45, %46 : vector<64x128xf32>
    %48 = math.tanh %44 : vector<64x128xf32>
    %49 = math.tanh %47 : vector<64x128xf32>
    %c4 = arith.constant 4 : index
    %c0_30 = arith.constant 0 : index
    %c0_31 = arith.constant 0 : index
    %50 = vector.load %arg2[%c4, %c0_30, %c0_31] : memref<5x128x128xf32, #tpu.memory_space<vmem>>, vector<1x128x128xf32>
    %51 = vector.shape_cast %50 : vector<1x128x128xf32> to vector<128x128xf32>
    %c4_32 = arith.constant 4 : index
    %c0_33 = arith.constant 0 : index
    %c0_34 = arith.constant 0 : index
    %52 = vector.load %arg3[%c4_32, %c0_33, %c0_34] : memref<5x1x128xf32, #tpu.memory_space<vmem>>, vector<1x1x128xf32>
    %53 = vector.shape_cast %52 : vector<1x1x128xf32> to vector<1x128xf32>
    %cst_35 = arith.constant dense<0.000000e+00> : vector<64x128xf32>
    %54 = tpu.matmul %48, %51, %cst_35 {dimension_numbers = #tpu.dot_dimension_numbers<[1], [0], [0], [1], [0, 0, 1, 1], [], []>} : vector<64x128xf32>, vector<128x128xf32>, vector<64x128xf32> -> vector<64x128xf32>
    %55 = vector.broadcast %53 : vector<1x128xf32> to vector<64x128xf32>
    %56 = arith.addf %54, %55 : vector<64x128xf32>
    %cst_36 = arith.constant dense<0.000000e+00> : vector<64x128xf32>
    %57 = tpu.matmul %49, %51, %cst_36 {dimension_numbers = #tpu.dot_dimension_numbers<[1], [0], [0], [1], [0, 0, 1, 1], [], []>} : vector<64x128xf32>, vector<128x128xf32>, vector<64x128xf32> -> vector<64x128xf32>
    %58 = vector.broadcast %53 : vector<1x128xf32> to vector<64x128xf32>
    %59 = arith.addf %57, %58 : vector<64x128xf32>
    %c0_37 = arith.constant 0 : index
    %c0_38 = arith.constant 0 : index
    %60 = vector.load %arg4[%c0_37, %c0_38] : memref<128x128xf32, #tpu.memory_space<vmem>>, vector<64x128xf32>
    tpu.vector_store %arg4[%c0_37, %c0_38], %56 {strides = array<i32>} : memref<128x128xf32, #tpu.memory_space<vmem>>, vector<64x128xf32>,
    %c64_39 = arith.constant 64 : index
    %c0_40 = arith.constant 0 : index
    %61 = vector.load %arg4[%c64_39, %c0_40] : memref<128x128xf32, #tpu.memory_space<vmem>>, vector<64x128xf32>
    tpu.vector_store %arg4[%c64_39, %c0_40], %59 {strides = array<i32>} : memref<128x128xf32, #tpu.memory_space<vmem>>, vector<64x128xf32>,
    return
  }
  func.func @transform_0(%arg0: i32) -> (i32, i32) {
    %c0_i32 = arith.constant 0 : i32
    %c0_i32_0 = arith.constant 0 : i32
    return %arg0, %c0_i32 : i32, i32
  }
  func.func @transform_1(%arg0: i32) -> (i32, i32, i32) {
    %c0_i32 = arith.constant 0 : i32
    %c0_i32_0 = arith.constant 0 : i32
    %c0_i32_1 = arith.constant 0 : i32
    %c0_i32_2 = arith.constant 0 : i32
    return %c0_i32, %c0_i32_0, %c0_i32_1 : i32, i32, i32
  }
  func.func @transform_2(%arg0: i32) -> (i32, i32, i32) {
    %c0_i32 = arith.constant 0 : i32
    %c0_i32_0 = arith.constant 0 : i32
    %c0_i32_1 = arith.constant 0 : i32
    %c0_i32_2 = arith.constant 0 : i32
    return %c0_i32, %c0_i32_0, %c0_i32_1 : i32, i32, i32
  }
  func.func @transform_3(%arg0: i32) -> (i32, i32) {
    %c0_i32 = arith.constant 0 : i32
    %c0_i32_0 = arith.constant 0 : i32
    return %arg0, %c0_i32 : i32, i32
  }
}

</mosaic_0001>

<bundles_post_ra>
// kernel: _forward.1
= control target key start
LH: loop header
LB: loop body
LE: loop exit
PB: predicated region body
PF: predicated region fallthrough
CT: control target
= control target key end

     0   :  { %s2427_s12 = smov 0   ;;  %s2762_s0 = inlined_call_operand.vmem [shape: f32[256,128], index: 0, kind: input, shape index: {}]   ;;  %s2763_s1 = inlined_call_operand.vmem [shape: f32[5,128,128], index: 1, kind: input, shape index: {}]   ;;  %s2764_s2 = inlined_call_operand.vmem [shape: f32[5,1,128], index: 2, kind: input, shape index: {}]   ;;  %s2765_s3 = inlined_call_operand.vmem [shape: f32[256,128], index: 3, kind: output, shape index: {}]  }
   0x1 LB: > { %s1499_s13 = sadd.s32 4294967295, %s2405_s12   ;;  %p1503_p0 = scmp.ge.s32.totalorder %s2405_s12, 1  ;;  %s2405_s12 = sphi %s2427_s12, %s13_s12  }
   0x2   : > { %p138_p1 = scmp.lt.s32.totalorder %s2405_s12, 3 }
   0x4   : > { %p139_p2 = pnand %p1503_p0, %p138_p1 }
   0x5   : > { %s1504_s30 = sshll.u32 (!%p139_p2), %s1499_s13, 4 }
   0x6   : > { %142 = sbr.rel (%p139_p2) target bundleno = 1104 (0x450), region = 32  ;;  %p163_p3 = scmp.lt.s32.totalorder (!%p139_p2), %s1504_s30, 31 }
   0xb   : > { %v205_v0 = vld [vmem:[%s2763_s1 + $0x78] sm:$0xff]  ;;  %v204_v1 = vld [vmem:[%s2763_s1 + $0x70] sm:$0xff]  ;;  %v203_v2 = vld [vmem:[%s2763_s1 + $0x68] sm:$0xff]  ;;  %s2767_s30 = smov (!%p163_p3, %s1504_s30), 31 }
   0xc   : > { %1823 = vmatprep.subr.mxu0 %v205_v0  ;;  %1867 = vmatprep.subr.mxu1 %v205_v0  ;;  %v202_v3 = vld [vmem:[%s2763_s1 + $0x60] sm:$0xff]  ;;  %v201_v4 = vld [vmem:[%s2763_s1 + $0x58] sm:$0xff]  ;;  %v200_v5 = vld [vmem:[%s2763_s1 + $0x50] sm:$0xff]  ;;  %s1505_s15 = sshll.u32 %s2767_s30, 3 }
   0xd   : > { %1824 = vmatpush3.msra.mxu0 %v205_v0  ;;  %1868 = vmatpush3.msra.mxu1 %v205_v0  ;;  %v199_v6 = vld [vmem:[%s2763_s1 + $0x48] sm:$0xff]  ;;  %v198_v7 = vld [vmem:[%s2763_s1 + $0x40] sm:$0xff]  ;;  %v197_v8 = vld [vmem:[%s2763_s1 + $0x38] sm:$0xff]  ;;  %s2490_s22 = scalar_lea.vmem %s2762_s0, %s1505_s15  ;;  %s2741_s21 = scalar_lea.vmem %s2765_s3, %s1505_s15 }
   0xe   : > { %1825 = vmatprep.subr.mxu0 %v204_v1  ;;  %1869 = vmatprep.subr.mxu1 %v204_v1  ;;  %v196_v9 = vld [vmem:[%s2763_s1 + $0x30] sm:$0xff]  ;;  %v195_v10 = vld [vmem:[%s2763_s1 + $0x28] sm:$0xff]  ;;  %v194_v11 = vld [vmem:[%s2763_s1 + $0x20] sm:$0xff] }
   0xf   : > { %1826 = vmatpush3.msra.mxu0 %v204_v1  ;;  %1870 = vmatpush3.msra.mxu1 %v204_v1  ;;  %v193_v12 = vld [vmem:[%s2763_s1 + $0x18] sm:$0xff]  ;;  %v192_v13 = vld [vmem:[%s2763_s1 + $0x10] sm:$0xff]  ;;  %v191_v14 = vld [vmem:[%s2763_s1 + $0x8] sm:$0xff] }
  0x10   : > { %1827 = vmatprep.subr.mxu0 %v203_v2  ;;  %1871 = vmatprep.subr.mxu1 %v203_v2  ;;  %v190_v15 = vld [vmem:[%s2763_s1] sm:$0xff]  ;;  %v175_v18 = vld [vmem:[%s2490_s22 + $0x8] sm:$0xff]  ;;  %v176_v20 = vld [vmem:[%s2490_s22 + $0x10] sm:$0xff] }
  0x11   : > { %1828 = vmatpush3.msra.mxu0 %v203_v2  ;;  %1872 = vmatpush3.msra.mxu1 %v203_v2  ;;  %v174_v16 = vld [vmem:[%s2490_s22] sm:$0xff]  ;;  %v183_v19 = vld [vmem:[%s2490_s22 + $0x48] sm:$0xff]  ;;  %v184_v21 = vld [vmem:[%s2490_s22 + $0x50] sm:$0xff] }
  0x12   : > { %1829 = vmatprep.subr.mxu0 %v202_v3  ;;  %1873 = vmatprep.subr.mxu1 %v202_v3  ;;  %v182_v17 = vld [vmem:[%s2490_s22 + $0x40] sm:$0xff]  ;;  %v1524_v22 = vld [vmem:[%s2763_s1 + $0xf8] sm:$0xff]  ;;  %v1523_v27 = vld [vmem:[%s2763_s1 + $0xf0] sm:$0xff] }
  0x13   : > { %1830 = vmatpush3.msra.mxu0 %v202_v3  ;;  %1874 = vmatpush3.msra.mxu1 %v202_v3  ;;  %v177_v23 = vld [vmem:[%s2490_s22 + $0x18] sm:$0xff]  ;;  %v178_v25 = vld [vmem:[%s2490_s22 + $0x20] sm:$0xff]  ;;  %v179_v28 = vld [vmem:[%s2490_s22 + $0x28] sm:$0xff] }
  0x14   : > { %1831 = vmatprep.subr.mxu0 %v201_v4  ;;  %1875 = vmatprep.subr.mxu1 %v201_v4  ;;  %v185_v24 = vld [vmem:[%s2490_s22 + $0x58] sm:$0xff]  ;;  %v186_v26 = vld [vmem:[%s2490_s22 + $0x60] sm:$0xff]  ;;  %v187_v29 = vld [vmem:[%s2490_s22 + $0x68] sm:$0xff] }
  0x15   : > { %1832 = vmatpush3.msra.mxu0 %v201_v4  ;;  %1876 = vmatpush3.msra.mxu1 %v201_v4  ;;  %v180_v30 = vld [vmem:[%s2490_s22 + $0x30] sm:$0xff]  ;;  %v1522_v32 = vld [vmem:[%s2763_s1 + $0xe8] sm:$0xff]  ;;  %v181_v33 = vld [vmem:[%s2490_s22 + $0x38] sm:$0xff] }
  0x16   : > { %1833 = vmatprep.subr.mxu0 %v200_v5  ;;  %1877 = vmatprep.subr.mxu1 %v200_v5  ;;  %v188_v31 = vld [vmem:[%s2490_s22 + $0x70] sm:$0xff]  ;;  %v189_v34 = vld [vmem:[%s2490_s22 + $0x78] sm:$0xff]  ;;  %v1521_v35 = vld [vmem:[%s2763_s1 + $0xe0] sm:$0xff] }
  0x17   : > { %1834 = vmatpush3.msra.mxu0 %v200_v5  ;;  %1878 = vmatpush3.msra.mxu1 %v200_v5  ;;  %v1520_v36 = vld [vmem:[%s2763_s1 + $0xd8] sm:$0xff]  ;;  %v1519_v37 = vld [vmem:[%s2763_s1 + $0xd0] sm:$0xff]  ;;  %v1518_v38 = vld [vmem:[%s2763_s1 + $0xc8] sm:$0xff] }
  0x18   : > { %1835 = vmatprep.subr.mxu0 %v199_v6  ;;  %1879 = vmatprep.subr.mxu1 %v199_v6  ;;  %v1517_v39 = vld [vmem:[%s2763_s1 + $0xc0] sm:$0xff]  ;;  %v1516_v40 = vld [vmem:[%s2763_s1 + $0xb8] sm:$0xff]  ;;  %v1515_v41 = vld [vmem:[%s2763_s1 + $0xb0] sm:$0xff] }
  0x19   : > { %1836 = vmatpush3.msra.mxu0 %v199_v6  ;;  %1880 = vmatpush3.msra.mxu1 %v199_v6  ;;  %v1514_v42 = vld [vmem:[%s2763_s1 + $0xa8] sm:$0xff]  ;;  %v1513_v43 = vld [vmem:[%s2763_s1 + $0xa0] sm:$0xff]  ;;  %v1512_v44 = vld [vmem:[%s2763_s1 + $0x98] sm:$0xff] }
  0x1a   : > { %1837 = vmatprep.subr.mxu0 %v198_v7  ;;  %1881 = vmatprep.subr.mxu1 %v198_v7  ;;  %v1511_v45 = vld [vmem:[%s2763_s1 + $0x90] sm:$0xff]  ;;  %v1510_v46 = vld [vmem:[%s2763_s1 + $0x88] sm:$0xff]  ;;  %v1509_v47 = vld [vmem:[%s2763_s1 + $0x80] sm:$0xff] }
  0x1b   : > { %1838 = vmatpush3.msra.mxu0 %v198_v7  ;;  %1882 = vmatpush3.msra.mxu1 %v198_v7  ;;  %v2562_v48 = vld [vmem:[%s2763_s1 + $0x178] sm:$0xff]  ;;  %v1508_v49 = vld [vmem:[%s2764_s2] ss:$0 sm:$0xff] }
  0x1c   : > { %1839 = vmatprep.subr.mxu0 %v197_v8  ;;  %1883 = vmatprep.subr.mxu1 %v197_v8 }
  0x1d   : > { %1840 = vmatpush3.msra.mxu0 %v197_v8  ;;  %1884 = vmatpush3.msra.mxu1 %v197_v8 }
  0x1e   : > { %1841 = vmatprep.subr.mxu0 %v196_v9  ;;  %1885 = vmatprep.subr.mxu1 %v196_v9 }
  0x1f   : > { %1842 = vmatpush3.msra.mxu0 %v196_v9  ;;  %1886 = vmatpush3.msra.mxu1 %v196_v9 }
  0x20   : > { %1843 = vmatprep.subr.mxu0 %v195_v10  ;;  %1887 = vmatprep.subr.mxu1 %v195_v10 }
  0x21   : > { %1844 = vmatpush3.msra.mxu0 %v195_v10  ;;  %1888 = vmatpush3.msra.mxu1 %v195_v10 }
  0x22   : > { %1845 = vmatprep.subr.mxu0 %v194_v11  ;;  %1889 = vmatprep.subr.mxu1 %v194_v11 }
  0x23   : > { %1846 = vmatpush3.msra.mxu0 %v194_v11  ;;  %1890 = vmatpush3.msra.mxu1 %v194_v11 }
  0x24   : > { %1847 = vmatprep.subr.mxu0 %v193_v12  ;;  %1891 = vmatprep.subr.mxu1 %v193_v12 }
  0x25   : > { %1848 = vmatpush3.msra.mxu0 %v193_v12  ;;  %1892 = vmatpush3.msra.mxu1 %v193_v12 }
  0x26   : > { %1849 = vmatprep.subr.mxu0 %v192_v13  ;;  %1893 = vmatprep.subr.mxu1 %v192_v13 }
  0x27   : > { %1850 = vmatpush3.msra.mxu0 %v192_v13  ;;  %1894 = vmatpush3.msra.mxu1 %v192_v13 }
  0x28   : > { %1851 = vmatprep.subr.mxu0 %v191_v14  ;;  %1895 = vmatprep.subr.mxu1 %v191_v14 }
  0x29   : > { %1852 = vmatpush3.msra.mxu0 %v191_v14  ;;  %1896 = vmatpush3.msra.mxu1 %v191_v14 }
  0x2a   : > { %1853 = vmatprep.subr.mxu0 %v190_v15  ;;  %1897 = vmatprep.subr.mxu1 %v190_v15 }
  0x2b   : > { %1854 = vmatpush3.msra.mxu0 %v190_v15  ;;  %1855 = vmatprep.mubr.f32.mxu0 %v174_v16 }
  0x2c   : > { %1898 = vmatpush3.msra.mxu1 %v190_v15  ;;  %1899 = vmatprep.mubr.f32.mxu1 %v182_v17 }
  0x2d   : > { %1856 = vmatmul.mubr.f32.vlgmr.msra.gmra.mxu0 %v175_v18  ;;  %1900 = vmatmul.mubr.f32.vlgmr.msra.gmra.mxu1 %v183_v19 }
  0x2e   : > { %1858 = vmatprep.mubr.f32.mxu0 %v176_v20  ;;  %1902 = vmatprep.mubr.f32.mxu1 %v184_v21  ;;  %v1541_v21 = vld [vmem:[%s2763_s1 + $0x170] sm:$0xff] }
  0x2f   : > { %1911 = vmatprep.subr.mxu0 %v1524_v22  ;;  %1955 = vmatprep.subr.mxu1 %v1524_v22 }
  0x30   : > { %1912 = vmatpush3.msra.mxu0 %v1524_v22  ;;  %1956 = vmatpush3.msra.mxu1 %v1524_v22 }
  0x31   : > { %1859 = vmatmul.mubr.f32.gmra.mxu0 %v177_v23  ;;  %1903 = vmatmul.mubr.f32.gmra.mxu1 %v185_v24 }
  0x32   : > { %1861 = vmatprep.mubr.f32.mxu0 %v178_v25  ;;  %1905 = vmatprep.mubr.f32.mxu1 %v186_v26  ;;  %v1540_v26 = vld [vmem:[%s2763_s1 + $0x168] sm:$0xff] }
  0x33   : > { %1913 = vmatprep.subr.mxu0 %v1523_v27  ;;  %1957 = vmatprep.subr.mxu1 %v1523_v27 }
  0x34   : > { %1914 = vmatpush3.msra.mxu0 %v1523_v27  ;;  %1958 = vmatpush3.msra.mxu1 %v1523_v27 }
  0x35   : > { %1862 = vmatmul.mubr.f32.gmra.mxu0 %v179_v28  ;;  %1906 = vmatmul.mubr.f32.gmra.mxu1 %v187_v29 }
  0x36   : > { %1864 = vmatprep.mubr.f32.mxu0 %v180_v30  ;;  %1908 = vmatprep.mubr.f32.mxu1 %v188_v31  ;;  %v1539_v31 = vld [vmem:[%s2763_s1 + $0x160] sm:$0xff] }
  0x37   : > { %1915 = vmatprep.subr.mxu0 %v1522_v32  ;;  %1959 = vmatprep.subr.mxu1 %v1522_v32 }
  0x38   : > { %1916 = vmatpush3.msra.mxu0 %v1522_v32  ;;  %1960 = vmatpush3.msra.mxu1 %v1522_v32 }
  0x39   : > { %1865 = vmatmul.mubr.f32.gmra.mxu0 %v181_v33  ;;  %1909 = vmatmul.mubr.f32.gmra.mxu1 %v189_v34 }
  0x3a   : > { %1917 = vmatprep.subr.mxu0 %v1521_v35  ;;  %1961 = vmatprep.subr.mxu1 %v1521_v35 }
  0x3b   : > { %1918 = vmatpush3.msra.mxu0 %v1521_v35  ;;  %1962 = vmatpush3.msra.mxu1 %v1521_v35 }
  0x3c   : > { %1919 = vmatprep.subr.mxu0 %v1520_v36  ;;  %1963 = vmatprep.subr.mxu1 %v1520_v36 }
  0x3d   : > { %1920 = vmatpush3.msra.mxu0 %v1520_v36  ;;  %1964 = vmatpush3.msra.mxu1 %v1520_v36  ;;  %v1538_v36 = vld [vmem:[%s2763_s1 + $0x158] sm:$0xff] }
  0x3e   : > { %1921 = vmatprep.subr.mxu0 %v1519_v37  ;;  %1965 = vmatprep.subr.mxu1 %v1519_v37 }
  0x3f   : > { %1922 = vmatpush3.msra.mxu0 %v1519_v37  ;;  %1966 = vmatpush3.msra.mxu1 %v1519_v37 }
  0x40   : > { %1923 = vmatprep.subr.mxu0 %v1518_v38  ;;  %1967 = vmatprep.subr.mxu1 %v1518_v38 }
  0x41   : > { %1924 = vmatpush3.msra.mxu0 %v1518_v38  ;;  %1968 = vmatpush3.msra.mxu1 %v1518_v38  ;;  %v1537_v38 = vld [vmem:[%s2763_s1 + $0x150] sm:$0xff] }
  0x42   : > { %1925 = vmatprep.subr.mxu0 %v1517_v39  ;;  %1969 = vmatprep.subr.mxu1 %v1517_v39 }
  0x43   : > { %1926 = vmatpush3.msra.mxu0 %v1517_v39  ;;  %1970 = vmatpush3.msra.mxu1 %v1517_v39  ;;  %v1536_v39 = vld [vmem:[%s2763_s1 + $0x148] sm:$0xff] }
  0x44   : > { %1927 = vmatprep.subr.mxu0 %v1516_v40  ;;  %1971 = vmatprep.subr.mxu1 %v1516_v40 }
  0x45   : > { %1928 = vmatpush3.msra.mxu0 %v1516_v40  ;;  %1972 = vmatpush3.msra.mxu1 %v1516_v40  ;;  %v1535_v40 = vld [vmem:[%s2763_s1 + $0x140] sm:$0xff] }
  0x46   : > { %1929 = vmatprep.subr.mxu0 %v1515_v41  ;;  %1973 = vmatprep.subr.mxu1 %v1515_v41 }
  0x47   : > { %1930 = vmatpush3.msra.mxu0 %v1515_v41  ;;  %1974 = vmatpush3.msra.mxu1 %v1515_v41  ;;  %v1534_v41 = vld [vmem:[%s2763_s1 + $0x138] sm:$0xff] }
  0x48   : > { %1931 = vmatprep.subr.mxu0 %v1514_v42  ;;  %1975 = vmatprep.subr.mxu1 %v1514_v42 }
  0x49   : > { %1932 = vmatpush3.msra.mxu0 %v1514_v42  ;;  %1976 = vmatpush3.msra.mxu1 %v1514_v42  ;;  %v1533_v42 = vld [vmem:[%s2763_s1 + $0x130] sm:$0xff] }
  0x4a   : > { %1933 = vmatprep.subr.mxu0 %v1513_v43  ;;  %1977 = vmatprep.subr.mxu1 %v1513_v43 }
  0x4b   : > { %1934 = vmatpush3.msra.mxu0 %v1513_v43  ;;  %1978 = vmatpush3.msra.mxu1 %v1513_v43  ;;  %v1532_v43 = vld [vmem:[%s2763_s1 + $0x128] sm:$0xff] }
  0x4c   : > { %1935 = vmatprep.subr.mxu0 %v1512_v44  ;;  %1979 = vmatprep.subr.mxu1 %v1512_v44 }
  0x4d   : > { %1936 = vmatpush3.msra.mxu0 %v1512_v44  ;;  %1980 = vmatpush3.msra.mxu1 %v1512_v44  ;;  %v1531_v44 = vld [vmem:[%s2763_s1 + $0x120] sm:$0xff] }
  0x4e   : > { %1937 = vmatprep.subr.mxu0 %v1511_v45  ;;  %1981 = vmatprep.subr.mxu1 %v1511_v45 }
  0x4f   : > { %1938 = vmatpush3.msra.mxu0 %v1511_v45  ;;  %1982 = vmatpush3.msra.mxu1 %v1511_v45  ;;  %v1530_v45 = vld [vmem:[%s2763_s1 + $0x118] sm:$0xff] }
  0x50   : > { %1939 = vmatprep.subr.mxu0 %v1510_v46  ;;  %1983 = vmatprep.subr.mxu1 %v1510_v46 }
  0x51   : > { %1940 = vmatpush3.msra.mxu0 %v1510_v46  ;;  %1984 = vmatpush3.msra.mxu1 %v1510_v46  ;;  %v1529_v46 = vld [vmem:[%s2763_s1 + $0x110] sm:$0xff] }
  0x52   : > { %1941 = vmatprep.subr.mxu0 %v1509_v47  ;;  %1985 = vmatprep.subr.mxu1 %v1509_v47 }
  0x53   : > { %1942 = vmatpush3.msra.mxu0 %v1509_v47  ;;  %1986 = vmatpush3.msra.mxu1 %v1509_v47  ;;  %v1528_v47 = vld [vmem:[%s2763_s1 + $0x108] sm:$0xff] }
  0x54   : > { %1999 = vmatprep.subr.mxu0 %v2562_v48  ;;  %2043 = vmatprep.subr.mxu1 %v2562_v48 }
  0xed   : > { %v1857_v50 = vpop.f32.mrf.mxu0  ;;  %v1901_v51 = vpop.f32.mrf.mxu1 }
  0xee   : > { %v285_v52 = vadd.f32 %v1857_v50, %v1508_v49  ;;  %v390_v55 = vadd.f32 %v1901_v51, %v1508_v49  ;;  %v1526_v50 = vld [vmem:[%s2764_s2 + $0x1] ss:$0 sm:$0xff] }
  0xef   : > { %v279_v53 = vpop.f32.mrf.mxu0  ;;  %v384_v54 = vpop.f32.mrf.mxu1 }
  0xf0   : > { %v280_v56 = vadd.f32 %v1508_v49, %v279_v53  ;;  %v385_v57 = vadd.f32 %v1508_v49, %v384_v54  ;;  %2271 = vtanh.f32 %v285_v52 }
  0xf1   : > { %v1860_v58 = vpop.f32.mrf.mxu0  ;;  %v1904_v59 = vpop.f32.mrf.mxu1 }
  0xf2   : > { %2273 = vtanh.f32 %v280_v56  ;;  %v295_v60 = vadd.f32 %v1860_v58, %v1508_v49  ;;  %v400_v63 = vadd.f32 %v1904_v59, %v1508_v49 }
  0xf3   : > { %2275 = vtanh.f32 %v385_v57  ;;  %v289_v61 = vpop.f32.mrf.mxu0  ;;  %v394_v62 = vpop.f32.mrf.mxu1 }
  0xf4   : > { %2277 = vtanh.f32 %v390_v55  ;;  %v290_v0 = vadd.f32 %v1508_v49, %v289_v61  ;;  %v395_v1 = vadd.f32 %v1508_v49, %v394_v62 }
  0xf5   : > { %2279 = vtanh.f32 %v295_v60  ;;  %v1863_v2 = vpop.f32.mrf.mxu0  ;;  %v1907_v3 = vpop.f32.mrf.mxu1 }
  0xf6   : > { %2281 = vtanh.f32 %v290_v0  ;;  %v305_v4 = vadd.f32 %v1863_v2, %v1508_v49  ;;  %v410_v7 = vadd.f32 %v1907_v3, %v1508_v49 }
  0xf7   : > { %2283 = vtanh.f32 %v395_v1  ;;  %v299_v5 = vpop.f32.mrf.mxu0  ;;  %v404_v6 = vpop.f32.mrf.mxu1 }
  0xf8   : > { %2285 = vtanh.f32 %v400_v63  ;;  %v300_v8 = vadd.f32 %v1508_v49, %v299_v5  ;;  %v405_v9 = vadd.f32 %v1508_v49, %v404_v6 }
  0xf9   : > { %2287 = vtanh.f32 %v305_v4  ;;  %v1866_v10 = vpop.f32.mrf.mxu0  ;;  %v1910_v11 = vpop.f32.mrf.mxu1 }
  0xfa   : > { %2289 = vtanh.f32 %v300_v8  ;;  %v315_v12 = vadd.f32 %v1866_v10, %v1508_v49  ;;  %v420_v15 = vadd.f32 %v1910_v11, %v1508_v49 }
  0xfb   : > { %2291 = vtanh.f32 %v405_v9  ;;  %v309_v13 = vpop.f32.mrf.mxu0  ;;  %v414_v14 = vpop.f32.mrf.mxu1 }
  0xfc   : > { %2293 = vtanh.f32 %v410_v7  ;;  %v310_v16 = vadd.f32 %v1508_v49, %v309_v13  ;;  %v415_v17 = vadd.f32 %v1508_v49, %v414_v14  ;;  %v2619_v49 = vld [vmem:[%s2763_s1 + $0x1f8] sm:$0xff] }
  0xfd   : > { %2295 = vtanh.f32 %v315_v12  ;;  %v2272_v18 = vpop.eup %2271 }
  0xfe   : > { %2297 = vtanh.f32 %v310_v16 }
  0xff   : > { %v2274_v19 = vpop.eup %2273  ;;  %2299 = vtanh.f32 %v415_v17 }
 0x100   : > { %v2276_v20 = vpop.eup %2275  ;;  %2301 = vtanh.f32 %v420_v15  ;;  %1943 = vmatprep.mubr.f32.mxu0 %v2274_v19 }
 0x101   : > { %v2278_v22 = vpop.eup %2277  ;;  %1987 = vmatprep.mubr.f32.mxu1 %v2276_v20  ;;  %1944 = vmatmul.mubr.f32.vlgmr.msra.gmra.mxu0 %v2272_v18 }
 0x102   : > { %v2280_v23 = vpop.eup %2279  ;;  %1988 = vmatmul.mubr.f32.vlgmr.msra.gmra.mxu1 %v2278_v22  ;;  %2000 = vmatpush3.msra.mxu0 %v2562_v48  ;;  %v1559_v22 = vld [vmem:[%s2763_s1 + $0x1f0] sm:$0xff] }
 0x103   : > { %v2282_v24 = vpop.eup %2281  ;;  %2044 = vmatpush3.msra.mxu1 %v2562_v48  ;;  %2001 = vmatprep.subr.mxu0 %v1541_v21  ;;  %v1527_v48 = vld [vmem:[%s2763_s1 + $0x100] sm:$0xff] }
 0x104   : > { %v2284_v25 = vpop.eup %2283  ;;  %1946 = vmatprep.mubr.f32.mxu0 %v2282_v24  ;;  %2045 = vmatprep.subr.mxu1 %v1541_v21 }
 0x105   : > { %v2286_v27 = vpop.eup %2285  ;;  %1990 = vmatprep.mubr.f32.mxu1 %v2284_v25  ;;  %1947 = vmatmul.mubr.f32.gmra.mxu0 %v2280_v23 }
 0x106   : > { %v2288_v28 = vpop.eup %2287  ;;  %1991 = vmatmul.mubr.f32.gmra.mxu1 %v2286_v27  ;;  %2002 = vmatpush3.msra.mxu0 %v1541_v21  ;;  %v1558_v27 = vld [vmem:[%s2763_s1 + $0x1e8] sm:$0xff] }
 0x107   : > { %v2290_v29 = vpop.eup %2289  ;;  %2046 = vmatpush3.msra.mxu1 %v1541_v21  ;;  %2003 = vmatprep.subr.mxu0 %v1540_v26 }
 0x108   : > { %v2292_v30 = vpop.eup %2291  ;;  %1949 = vmatprep.mubr.f32.mxu0 %v2290_v29  ;;  %2047 = vmatprep.subr.mxu1 %v1540_v26 }
 0x109   : > { %v2294_v32 = vpop.eup %2293  ;;  %1993 = vmatprep.mubr.f32.mxu1 %v2292_v30  ;;  %1950 = vmatmul.mubr.f32.gmra.mxu0 %v2288_v28 }
 0x10a   : > { %v2296_v33 = vpop.eup %2295  ;;  %1994 = vmatmul.mubr.f32.gmra.mxu1 %v2294_v32  ;;  %2004 = vmatpush3.msra.mxu0 %v1540_v26  ;;  %v1557_v32 = vld [vmem:[%s2763_s1 + $0x1e0] sm:$0xff] }
 0x10b   : > { %v2298_v34 = vpop.eup %2297  ;;  %2048 = vmatpush3.msra.mxu1 %v1540_v26  ;;  %2005 = vmatprep.subr.mxu0 %v1539_v31 }
 0x10c   : > { %v2300_v35 = vpop.eup %2299  ;;  %1952 = vmatprep.mubr.f32.mxu0 %v2298_v34  ;;  %2049 = vmatprep.subr.mxu1 %v1539_v31 }
 0x10d   : > { %v2302_v37 = vpop.eup %2301  ;;  %1996 = vmatprep.mubr.f32.mxu1 %v2300_v35  ;;  %1953 = vmatmul.mubr.f32.gmra.mxu0 %v2296_v33 }
 0x10e   : > { %1997 = vmatmul.mubr.f32.gmra.mxu1 %v2302_v37  ;;  %2006 = vmatpush3.msra.mxu0 %v1539_v31  ;;  %v1556_v37 = vld [vmem:[%s2763_s1 + $0x1d8] sm:$0xff] }
 0x10f   : > { %2050 = vmatpush3.msra.mxu1 %v1539_v31  ;;  %2007 = vmatprep.subr.mxu0 %v1538_v36 }
 0x110   : > { %2051 = vmatprep.subr.mxu1 %v1538_v36  ;;  %2008 = vmatpush3.msra.mxu0 %v1538_v36 }
 0x111   : > { %2052 = vmatpush3.msra.mxu1 %v1538_v36  ;;  %2009 = vmatprep.subr.mxu0 %v1537_v38 }
 0x112   : > { %2053 = vmatprep.subr.mxu1 %v1537_v38  ;;  %2010 = vmatpush3.msra.mxu0 %v1537_v38 }
 0x113   : > { %2054 = vmatpush3.msra.mxu1 %v1537_v38  ;;  %2011 = vmatprep.subr.mxu0 %v1536_v39 }
 0x114   : > { %2055 = vmatprep.subr.mxu1 %v1536_v39  ;;  %2012 = vmatpush3.msra.mxu0 %v1536_v39 }
 0x115   : > { %2056 = vmatpush3.msra.mxu1 %v1536_v39  ;;  %2013 = vmatprep.subr.mxu0 %v1535_v40  ;;  %v1555_v39 = vld [vmem:[%s2763_s1 + $0x1d0] sm:$0xff] }
 0x116   : > { %2057 = vmatprep.subr.mxu1 %v1535_v40  ;;  %2014 = vmatpush3.msra.mxu0 %v1535_v40 }
 0x117   : > { %2058 = vmatpush3.msra.mxu1 %v1535_v40  ;;  %2015 = vmatprep.subr.mxu0 %v1534_v41  ;;  %v1554_v40 = vld [vmem:[%s2763_s1 + $0x1c8] sm:$0xff] }
 0x118   : > { %2059 = vmatprep.subr.mxu1 %v1534_v41  ;;  %2016 = vmatpush3.msra.mxu0 %v1534_v41 }
 0x119   : > { %2060 = vmatpush3.msra.mxu1 %v1534_v41  ;;  %2017 = vmatprep.subr.mxu0 %v1533_v42  ;;  %v1553_v41 = vld [vmem:[%s2763_s1 + $0x1c0] sm:$0xff] }
 0x11a   : > { %2061 = vmatprep.subr.mxu1 %v1533_v42  ;;  %2018 = vmatpush3.msra.mxu0 %v1533_v42 }
 0x11b   : > { %2062 = vmatpush3.msra.mxu1 %v1533_v42  ;;  %2019 = vmatprep.subr.mxu0 %v1532_v43  ;;  %v1552_v42 = vld [vmem:[%s2763_s1 + $0x1b8] sm:$0xff] }
 0x11c   : > { %2063 = vmatprep.subr.mxu1 %v1532_v43  ;;  %2020 = vmatpush3.msra.mxu0 %v1532_v43 }
 0x11d   : > { %2064 = vmatpush3.msra.mxu1 %v1532_v43  ;;  %2021 = vmatprep.subr.mxu0 %v1531_v44  ;;  %v1551_v43 = vld [vmem:[%s2763_s1 + $0x1b0] sm:$0xff] }
 0x11e   : > { %2065 = vmatprep.subr.mxu1 %v1531_v44  ;;  %2022 = vmatpush3.msra.mxu0 %v1531_v44 }
 0x11f   : > { %2066 = vmatpush3.msra.mxu1 %v1531_v44  ;;  %2023 = vmatprep.subr.mxu0 %v1530_v45  ;;  %v1550_v44 = vld [vmem:[%s2763_s1 + $0x1a8] sm:$0xff] }
 0x120   : > { %2067 = vmatprep.subr.mxu1 %v1530_v45  ;;  %2024 = vmatpush3.msra.mxu0 %v1530_v45 }
 0x121   : > { %2068 = vmatpush3.msra.mxu1 %v1530_v45  ;;  %2025 = vmatprep.subr.mxu0 %v1529_v46  ;;  %v1549_v45 = vld [vmem:[%s2763_s1 + $0x1a0] sm:$0xff] }
 0x122   : > { %2069 = vmatprep.subr.mxu1 %v1529_v46  ;;  %2026 = vmatpush3.msra.mxu0 %v1529_v46 }
 0x123   : > { %2070 = vmatpush3.msra.mxu1 %v1529_v46  ;;  %2027 = vmatprep.subr.mxu0 %v1528_v47  ;;  %v1548_v46 = vld [vmem:[%s2763_s1 + $0x198] sm:$0xff] }
 0x124   : > { %2071 = vmatprep.subr.mxu1 %v1528_v47  ;;  %2028 = vmatpush3.msra.mxu0 %v1528_v47 }
 0x125   : > { %2072 = vmatpush3.msra.mxu1 %v1528_v47  ;;  %2029 = vmatprep.subr.mxu0 %v1527_v48  ;;  %v1547_v47 = vld [vmem:[%s2763_s1 + $0x190] sm:$0xff] }
 0x126   : > { %2073 = vmatprep.subr.mxu1 %v1527_v48  ;;  %2030 = vmatpush3.msra.mxu0 %v1527_v48 }
 0x127   : > { %2074 = vmatpush3.msra.mxu1 %v1527_v48  ;;  %2087 = vmatprep.subr.mxu0 %v2619_v49  ;;  %v1546_v48 = vld [vmem:[%s2763_s1 + $0x188] sm:$0xff] }
 0x128   : > { %2131 = vmatprep.subr.mxu1 %v2619_v49 }
 0x1c1   : > { %v1945_v51 = vpop.f32.mrf.mxu0 }
 0x1c2   : > { %v536_v52 = vadd.f32 %v1945_v51, %v1526_v50  ;;  %v1989_v53 = vpop.f32.mrf.mxu1  ;;  %v1544_v51 = vld [vmem:[%s2764_s2 + $0x2] ss:$0 sm:$0xff] }
 0x1c3   : > { %v530_v54 = vpop.f32.mrf.mxu0  ;;  %v641_v55 = vadd.f32 %v1989_v53, %v1526_v50 }
 0x1c4   : > { %v531_v56 = vadd.f32 %v1526_v50, %v530_v54  ;;  %v635_v57 = vpop.f32.mrf.mxu1  ;;  %2303 = vtanh.f32 %v536_v52 }
 0x1c5   : > { %v636_v58 = vadd.f32 %v1526_v50, %v635_v57  ;;  %v1948_v59 = vpop.f32.mrf.mxu0 }
 0x1c6   : > { %2305 = vtanh.f32 %v531_v56  ;;  %v546_v60 = vadd.f32 %v1948_v59, %v1526_v50  ;;  %v1992_v61 = vpop.f32.mrf.mxu1 }
 0x1c7   : > { %2307 = vtanh.f32 %v636_v58  ;;  %v540_v62 = vpop.f32.mrf.mxu0  ;;  %v651_v63 = vadd.f32 %v1992_v61, %v1526_v50 }
 0x1c8   : > { %2309 = vtanh.f32 %v641_v55  ;;  %v541_v0 = vadd.f32 %v1526_v50, %v540_v62  ;;  %v645_v1 = vpop.f32.mrf.mxu1 }
 0x1c9   : > { %2311 = vtanh.f32 %v546_v60  ;;  %v646_v2 = vadd.f32 %v1526_v50, %v645_v1  ;;  %v1951_v3 = vpop.f32.mrf.mxu0 }
 0x1ca   : > { %2313 = vtanh.f32 %v541_v0  ;;  %v556_v4 = vadd.f32 %v1951_v3, %v1526_v50  ;;  %v1995_v5 = vpop.f32.mrf.mxu1 }
 0x1cb   : > { %2315 = vtanh.f32 %v646_v2  ;;  %v550_v6 = vpop.f32.mrf.mxu0  ;;  %v661_v7 = vadd.f32 %v1995_v5, %v1526_v50 }
 0x1cc   : > { %2317 = vtanh.f32 %v651_v63  ;;  %v551_v8 = vadd.f32 %v1526_v50, %v550_v6  ;;  %v655_v9 = vpop.f32.mrf.mxu1 }
 0x1cd   : > { %2319 = vtanh.f32 %v556_v4  ;;  %v656_v10 = vadd.f32 %v1526_v50, %v655_v9  ;;  %v1954_v11 = vpop.f32.mrf.mxu0 }
 0x1ce   : > { %2321 = vtanh.f32 %v551_v8  ;;  %v566_v12 = vadd.f32 %v1954_v11, %v1526_v50  ;;  %v1998_v13 = vpop.f32.mrf.mxu1 }
 0x1cf   : > { %2323 = vtanh.f32 %v656_v10  ;;  %v560_v14 = vpop.f32.mrf.mxu0  ;;  %v671_v15 = vadd.f32 %v1998_v13, %v1526_v50 }
 0x1d0   : > { %2325 = vtanh.f32 %v661_v7  ;;  %v561_v16 = vadd.f32 %v1526_v50, %v560_v14  ;;  %v665_v17 = vpop.f32.mrf.mxu1 }
 0x1d1   : > { %2327 = vtanh.f32 %v566_v12  ;;  %v666_v18 = vadd.f32 %v1526_v50, %v665_v17  ;;  %v2304_v19 = vpop.eup %2303  ;;  %v2676_v50 = vld [vmem:[%s2763_s1 + $0x278] sm:$0xff] }
 0x1d2   : > { %2329 = vtanh.f32 %v561_v16 }
 0x1d3   : > { %v2306_v20 = vpop.eup %2305  ;;  %2331 = vtanh.f32 %v666_v18 }
 0x1d4   : > { %v2308_v21 = vpop.eup %2307  ;;  %2333 = vtanh.f32 %v671_v15  ;;  %2031 = vmatprep.mubr.f32.mxu0 %v2306_v20 }
 0x1d5   : > { %v2310_v23 = vpop.eup %2309  ;;  %2075 = vmatprep.mubr.f32.mxu1 %v2308_v21  ;;  %2032 = vmatmul.mubr.f32.vlgmr.msra.gmra.mxu0 %v2304_v19 }
 0x1d6   : > { %v2312_v24 = vpop.eup %2311  ;;  %2076 = vmatmul.mubr.f32.vlgmr.msra.gmra.mxu1 %v2310_v23  ;;  %2088 = vmatpush3.msra.mxu0 %v2619_v49  ;;  %v1577_v23 = vld [vmem:[%s2763_s1 + $0x270] sm:$0xff] }
 0x1d7   : > { %v2314_v25 = vpop.eup %2313  ;;  %2132 = vmatpush3.msra.mxu1 %v2619_v49  ;;  %2089 = vmatprep.subr.mxu0 %v1559_v22  ;;  %v1545_v49 = vld [vmem:[%s2763_s1 + $0x180] sm:$0xff] }
 0x1d8   : > { %v2316_v26 = vpop.eup %2315  ;;  %2034 = vmatprep.mubr.f32.mxu0 %v2314_v25  ;;  %2133 = vmatprep.subr.mxu1 %v1559_v22 }
 0x1d9   : > { %v2318_v28 = vpop.eup %2317  ;;  %2078 = vmatprep.mubr.f32.mxu1 %v2316_v26  ;;  %2035 = vmatmul.mubr.f32.gmra.mxu0 %v2312_v24 }
 0x1da   : > { %v2320_v29 = vpop.eup %2319  ;;  %2079 = vmatmul.mubr.f32.gmra.mxu1 %v2318_v28  ;;  %2090 = vmatpush3.msra.mxu0 %v1559_v22  ;;  %v1576_v28 = vld [vmem:[%s2763_s1 + $0x268] sm:$0xff] }
 0x1db   : > { %v2322_v30 = vpop.eup %2321  ;;  %2134 = vmatpush3.msra.mxu1 %v1559_v22  ;;  %2091 = vmatprep.subr.mxu0 %v1558_v27 }
 0x1dc   : > { %v2324_v31 = vpop.eup %2323  ;;  %2037 = vmatprep.mubr.f32.mxu0 %v2322_v30  ;;  %2135 = vmatprep.subr.mxu1 %v1558_v27 }
 0x1dd   : > { %v2326_v33 = vpop.eup %2325  ;;  %2081 = vmatprep.mubr.f32.mxu1 %v2324_v31  ;;  %2038 = vmatmul.mubr.f32.gmra.mxu0 %v2320_v29 }
 0x1de   : > { %v2328_v34 = vpop.eup %2327  ;;  %2082 = vmatmul.mubr.f32.gmra.mxu1 %v2326_v33  ;;  %2092 = vmatpush3.msra.mxu0 %v1558_v27  ;;  %v1575_v33 = vld [vmem:[%s2763_s1 + $0x260] sm:$0xff] }
 0x1df   : > { %v2330_v35 = vpop.eup %2329  ;;  %2136 = vmatpush3.msra.mxu1 %v1558_v27  ;;  %2093 = vmatprep.subr.mxu0 %v1557_v32 }
 0x1e0   : > { %v2332_v36 = vpop.eup %2331  ;;  %2040 = vmatprep.mubr.f32.mxu0 %v2330_v35  ;;  %2137 = vmatprep.subr.mxu1 %v1557_v32 }
 0x1e1   : > { %v2334_v38 = vpop.eup %2333  ;;  %2084 = vmatprep.mubr.f32.mxu1 %v2332_v36  ;;  %2041 = vmatmul.mubr.f32.gmra.mxu0 %v2328_v34 }
 0x1e2   : > { %2085 = vmatmul.mubr.f32.gmra.mxu1 %v2334_v38  ;;  %2094 = vmatpush3.msra.mxu0 %v1557_v32  ;;  %v1574_v38 = vld [vmem:[%s2763_s1 + $0x258] sm:$0xff] }
 0x1e3   : > { %2138 = vmatpush3.msra.mxu1 %v1557_v32  ;;  %2095 = vmatprep.subr.mxu0 %v1556_v37 }
 0x1e4   : > { %2139 = vmatprep.subr.mxu1 %v1556_v37  ;;  %2096 = vmatpush3.msra.mxu0 %v1556_v37 }
 0x1e5   : > { %2140 = vmatpush3.msra.mxu1 %v1556_v37  ;;  %2097 = vmatprep.subr.mxu0 %v1555_v39 }
 0x1e6   : > { %2141 = vmatprep.subr.mxu1 %v1555_v39  ;;  %2098 = vmatpush3.msra.mxu0 %v1555_v39 }
 0x1e7   : > { %2142 = vmatpush3.msra.mxu1 %v1555_v39  ;;  %2099 = vmatprep.subr.mxu0 %v1554_v40 }
 0x1e8   : > { %2143 = vmatprep.subr.mxu1 %v1554_v40  ;;  %2100 = vmatpush3.msra.mxu0 %v1554_v40 }
 0x1e9   : > { %2144 = vmatpush3.msra.mxu1 %v1554_v40  ;;  %2101 = vmatprep.subr.mxu0 %v1553_v41  ;;  %v1573_v40 = vld [vmem:[%s2763_s1 + $0x250] sm:$0xff] }
 0x1ea   : > { %2145 = vmatprep.subr.mxu1 %v1553_v41  ;;  %2102 = vmatpush3.msra.mxu0 %v1553_v41 }
 0x1eb   : > { %2146 = vmatpush3.msra.mxu1 %v1553_v41  ;;  %2103 = vmatprep.subr.mxu0 %v1552_v42  ;;  %v1572_v41 = vld [vmem:[%s2763_s1 + $0x248] sm:$0xff] }
 0x1ec   : > { %2147 = vmatprep.subr.mxu1 %v1552_v42  ;;  %2104 = vmatpush3.msra.mxu0 %v1552_v42 }
 0x1ed   : > { %2148 = vmatpush3.msra.mxu1 %v1552_v42  ;;  %2105 = vmatprep.subr.mxu0 %v1551_v43  ;;  %v1571_v42 = vld [vmem:[%s2763_s1 + $0x240] sm:$0xff] }
 0x1ee   : > { %2149 = vmatprep.subr.mxu1 %v1551_v43  ;;  %2106 = vmatpush3.msra.mxu0 %v1551_v43 }
 0x1ef   : > { %2150 = vmatpush3.msra.mxu1 %v1551_v43  ;;  %2107 = vmatprep.subr.mxu0 %v1550_v44  ;;  %v1570_v43 = vld [vmem:[%s2763_s1 + $0x238] sm:$0xff] }
 0x1f0   : > { %2151 = vmatprep.subr.mxu1 %v1550_v44  ;;  %2108 = vmatpush3.msra.mxu0 %v1550_v44 }
 0x1f1   : > { %2152 = vmatpush3.msra.mxu1 %v1550_v44  ;;  %2109 = vmatprep.subr.mxu0 %v1549_v45  ;;  %v1569_v44 = vld [vmem:[%s2763_s1 + $0x230] sm:$0xff] }
 0x1f2   : > { %2153 = vmatprep.subr.mxu1 %v1549_v45  ;;  %2110 = vmatpush3.msra.mxu0 %v1549_v45 }
 0x1f3   : > { %2154 = vmatpush3.msra.mxu1 %v1549_v45  ;;  %2111 = vmatprep.subr.mxu0 %v1548_v46  ;;  %v1568_v45 = vld [vmem:[%s2763_s1 + $0x228] sm:$0xff] }
 0x1f4   : > { %2155 = vmatprep.subr.mxu1 %v1548_v46  ;;  %2112 = vmatpush3.msra.mxu0 %v1548_v46 }
 0x1f5   : > { %2156 = vmatpush3.msra.mxu1 %v1548_v46  ;;  %2113 = vmatprep.subr.mxu0 %v1547_v47  ;;  %v1567_v46 = vld [vmem:[%s2763_s1 + $0x220] sm:$0xff] }
 0x1f6   : > { %2157 = vmatprep.subr.mxu1 %v1547_v47  ;;  %2114 = vmatpush3.msra.mxu0 %v1547_v47 }
 0x1f7   : > { %2158 = vmatpush3.msra.mxu1 %v1547_v47  ;;  %2115 = vmatprep.subr.mxu0 %v1546_v48  ;;  %v1566_v47 = vld [vmem:[%s2763_s1 + $0x218] sm:$0xff] }
 0x1f8   : > { %2159 = vmatprep.subr.mxu1 %v1546_v48  ;;  %2116 = vmatpush3.msra.mxu0 %v1546_v48 }
 0x1f9   : > { %2160 = vmatpush3.msra.mxu1 %v1546_v48  ;;  %2117 = vmatprep.subr.mxu0 %v1545_v49  ;;  %v1565_v48 = vld [vmem:[%s2763_s1 + $0x210] sm:$0xff] }
 0x1fa   : > { %2161 = vmatprep.subr.mxu1 %v1545_v49  ;;  %2118 = vmatpush3.msra.mxu0 %v1545_v49 }
 0x1fb   : > { %2162 = vmatpush3.msra.mxu1 %v1545_v49  ;;  %2175 = vmatprep.subr.mxu0 %v2676_v50  ;;  %v1564_v49 = vld [vmem:[%s2763_s1 + $0x208] sm:$0xff] }
 0x1fc   : > { %2219 = vmatprep.subr.mxu1 %v2676_v50 }
 0x295   : > { %v2033_v52 = vpop.f32.mrf.mxu0 }
 0x296   : > { %v787_v53 = vadd.f32 %v2033_v52, %v1544_v51  ;;  %v2077_v54 = vpop.f32.mrf.mxu1 }
 0x297   : > { %v781_v55 = vpop.f32.mrf.mxu0  ;;  %v892_v56 = vadd.f32 %v2077_v54, %v1544_v51 }
 0x298   : > { %v782_v57 = vadd.f32 %v1544_v51, %v781_v55  ;;  %v886_v58 = vpop.f32.mrf.mxu1  ;;  %2335 = vtanh.f32 %v787_v53 }
 0x299   : > { %v887_v59 = vadd.f32 %v1544_v51, %v886_v58  ;;  %v2036_v60 = vpop.f32.mrf.mxu0 }
 0x29a   : > { %2337 = vtanh.f32 %v782_v57  ;;  %v797_v61 = vadd.f32 %v2036_v60, %v1544_v51  ;;  %v2080_v62 = vpop.f32.mrf.mxu1 }
 0x29b   : > { %2339 = vtanh.f32 %v887_v59  ;;  %v791_v63 = vpop.f32.mrf.mxu0  ;;  %v902_v0 = vadd.f32 %v2080_v62, %v1544_v51 }
 0x29c   : > { %2341 = vtanh.f32 %v892_v56  ;;  %v792_v1 = vadd.f32 %v1544_v51, %v791_v63  ;;  %v896_v2 = vpop.f32.mrf.mxu1 }
 0x29d   : > { %2343 = vtanh.f32 %v797_v61  ;;  %v897_v3 = vadd.f32 %v1544_v51, %v896_v2  ;;  %v2039_v4 = vpop.f32.mrf.mxu0 }
 0x29e   : > { %2345 = vtanh.f32 %v792_v1  ;;  %v807_v5 = vadd.f32 %v2039_v4, %v1544_v51  ;;  %v2083_v6 = vpop.f32.mrf.mxu1 }
 0x29f   : > { %2347 = vtanh.f32 %v897_v3  ;;  %v801_v7 = vpop.f32.mrf.mxu0  ;;  %v912_v8 = vadd.f32 %v2083_v6, %v1544_v51 }
 0x2a0   : > { %2349 = vtanh.f32 %v902_v0  ;;  %v802_v9 = vadd.f32 %v1544_v51, %v801_v7  ;;  %v906_v10 = vpop.f32.mrf.mxu1 }
 0x2a1   : > { %2351 = vtanh.f32 %v807_v5  ;;  %v907_v11 = vadd.f32 %v1544_v51, %v906_v10  ;;  %v2042_v12 = vpop.f32.mrf.mxu0 }
 0x2a2   : > { %2353 = vtanh.f32 %v802_v9  ;;  %v817_v13 = vadd.f32 %v2042_v12, %v1544_v51  ;;  %v2086_v14 = vpop.f32.mrf.mxu1 }
 0x2a3   : > { %2355 = vtanh.f32 %v907_v11  ;;  %v811_v15 = vpop.f32.mrf.mxu0  ;;  %v922_v16 = vadd.f32 %v2086_v14, %v1544_v51 }
 0x2a4   : > { %2357 = vtanh.f32 %v912_v8  ;;  %v812_v17 = vadd.f32 %v1544_v51, %v811_v15  ;;  %v916_v18 = vpop.f32.mrf.mxu1 }
 0x2a5   : > { %2359 = vtanh.f32 %v817_v13  ;;  %v917_v19 = vadd.f32 %v1544_v51, %v916_v18  ;;  %v2336_v20 = vpop.eup %2335  ;;  %v1562_v51 = vld [vmem:[%s2764_s2 + $0x3] ss:$0 sm:$0xff] }
 0x2a6   : > { %2361 = vtanh.f32 %v812_v17 }
 0x2a7   : > { %v2338_v21 = vpop.eup %2337  ;;  %2363 = vtanh.f32 %v917_v19 }
 0x2a8   : > { %v2340_v22 = vpop.eup %2339  ;;  %2365 = vtanh.f32 %v922_v16  ;;  %2119 = vmatprep.mubr.f32.mxu0 %v2338_v21 }
 0x2a9   : > { %v2342_v24 = vpop.eup %2341  ;;  %2163 = vmatprep.mubr.f32.mxu1 %v2340_v22  ;;  %2120 = vmatmul.mubr.f32.vlgmr.msra.gmra.mxu0 %v2336_v20 }
 0x2aa   : > { %v2344_v25 = vpop.eup %2343  ;;  %2164 = vmatmul.mubr.f32.vlgmr.msra.gmra.mxu1 %v2342_v24  ;;  %2176 = vmatpush3.msra.mxu0 %v2676_v50 }
 0x2ab   : > { %v2346_v26 = vpop.eup %2345  ;;  %2220 = vmatpush3.msra.mxu1 %v2676_v50  ;;  %2177 = vmatprep.subr.mxu0 %v1577_v23  ;;  %v1563_v50 = vld [vmem:[%s2763_s1 + $0x200] sm:$0xff] }
 0x2ac   : > { %v2348_v27 = vpop.eup %2347  ;;  %2122 = vmatprep.mubr.f32.mxu0 %v2346_v26  ;;  %2221 = vmatprep.subr.mxu1 %v1577_v23 }
 0x2ad   : > { %v2350_v29 = vpop.eup %2349  ;;  %2166 = vmatprep.mubr.f32.mxu1 %v2348_v27  ;;  %2123 = vmatmul.mubr.f32.gmra.mxu0 %v2344_v25 }
 0x2ae   : > { %v2352_v30 = vpop.eup %2351  ;;  %2167 = vmatmul.mubr.f32.gmra.mxu1 %v2350_v29  ;;  %2178 = vmatpush3.msra.mxu0 %v1577_v23 }
 0x2af   : > { %v2354_v31 = vpop.eup %2353  ;;  %2222 = vmatpush3.msra.mxu1 %v1577_v23  ;;  %2179 = vmatprep.subr.mxu0 %v1576_v28 }
 0x2b0   : > { %v2356_v32 = vpop.eup %2355  ;;  %2125 = vmatprep.mubr.f32.mxu0 %v2354_v31  ;;  %2223 = vmatprep.subr.mxu1 %v1576_v28 }
 0x2b1   : > { %v2358_v34 = vpop.eup %2357  ;;  %2169 = vmatprep.mubr.f32.mxu1 %v2356_v32  ;;  %2126 = vmatmul.mubr.f32.gmra.mxu0 %v2352_v30 }
 0x2b2   : > { %v2360_v35 = vpop.eup %2359  ;;  %2170 = vmatmul.mubr.f32.gmra.mxu1 %v2358_v34  ;;  %2180 = vmatpush3.msra.mxu0 %v1576_v28 }
 0x2b3   : > { %v2362_v36 = vpop.eup %2361  ;;  %2224 = vmatpush3.msra.mxu1 %v1576_v28  ;;  %2181 = vmatprep.subr.mxu0 %v1575_v33 }
 0x2b4   : > { %v2364_v37 = vpop.eup %2363  ;;  %2128 = vmatprep.mubr.f32.mxu0 %v2362_v36  ;;  %2225 = vmatprep.subr.mxu1 %v1575_v33  ;;  %v1580_v36 = vld [vmem:[%s2764_s2 + $0x4] ss:$0 sm:$0xff] }
 0x2b5   : > { %v2366_v39 = vpop.eup %2365  ;;  %2172 = vmatprep.mubr.f32.mxu1 %v2364_v37  ;;  %2129 = vmatmul.mubr.f32.gmra.mxu0 %v2360_v35 }
 0x2b6   : > { %2173 = vmatmul.mubr.f32.gmra.mxu1 %v2366_v39  ;;  %2182 = vmatpush3.msra.mxu0 %v1575_v33 }
 0x2b7   : > { %2226 = vmatpush3.msra.mxu1 %v1575_v33  ;;  %2183 = vmatprep.subr.mxu0 %v1574_v38 }
 0x2b8   : > { %2227 = vmatprep.subr.mxu1 %v1574_v38  ;;  %2184 = vmatpush3.msra.mxu0 %v1574_v38 }
 0x2b9   : > { %2228 = vmatpush3.msra.mxu1 %v1574_v38  ;;  %2185 = vmatprep.subr.mxu0 %v1573_v40 }
 0x2ba   : > { %2229 = vmatprep.subr.mxu1 %v1573_v40  ;;  %2186 = vmatpush3.msra.mxu0 %v1573_v40 }
 0x2bb   : > { %2230 = vmatpush3.msra.mxu1 %v1573_v40  ;;  %2187 = vmatprep.subr.mxu0 %v1572_v41 }
 0x2bc   : > { %2231 = vmatprep.subr.mxu1 %v1572_v41  ;;  %2188 = vmatpush3.msra.mxu0 %v1572_v41 }
 0x2bd   : > { %2232 = vmatpush3.msra.mxu1 %v1572_v41  ;;  %2189 = vmatprep.subr.mxu0 %v1571_v42 }
 0x2be   : > { %2233 = vmatprep.subr.mxu1 %v1571_v42  ;;  %2190 = vmatpush3.msra.mxu0 %v1571_v42 }
 0x2bf   : > { %2234 = vmatpush3.msra.mxu1 %v1571_v42  ;;  %2191 = vmatprep.subr.mxu0 %v1570_v43 }
 0x2c0   : > { %2235 = vmatprep.subr.mxu1 %v1570_v43  ;;  %2192 = vmatpush3.msra.mxu0 %v1570_v43 }
 0x2c1   : > { %2236 = vmatpush3.msra.mxu1 %v1570_v43  ;;  %2193 = vmatprep.subr.mxu0 %v1569_v44 }
 0x2c2   : > { %2237 = vmatprep.subr.mxu1 %v1569_v44  ;;  %2194 = vmatpush3.msra.mxu0 %v1569_v44 }
 0x2c3   : > { %2238 = vmatpush3.msra.mxu1 %v1569_v44  ;;  %2195 = vmatprep.subr.mxu0 %v1568_v45 }
 0x2c4   : > { %2239 = vmatprep.subr.mxu1 %v1568_v45  ;;  %2196 = vmatpush3.msra.mxu0 %v1568_v45 }
 0x2c5   : > { %2240 = vmatpush3.msra.mxu1 %v1568_v45  ;;  %2197 = vmatprep.subr.mxu0 %v1567_v46 }
 0x2c6   : > { %2241 = vmatprep.subr.mxu1 %v1567_v46  ;;  %2198 = vmatpush3.msra.mxu0 %v1567_v46 }
 0x2c7   : > { %2242 = vmatpush3.msra.mxu1 %v1567_v46  ;;  %2199 = vmatprep.subr.mxu0 %v1566_v47 }
 0x2c8   : > { %2243 = vmatprep.subr.mxu1 %v1566_v47  ;;  %2200 = vmatpush3.msra.mxu0 %v1566_v47 }
 0x2c9   : > { %2244 = vmatpush3.msra.mxu1 %v1566_v47  ;;  %2201 = vmatprep.subr.mxu0 %v1565_v48 }
 0x2ca   : > { %2245 = vmatprep.subr.mxu1 %v1565_v48  ;;  %2202 = vmatpush3.msra.mxu0 %v1565_v48 }
 0x2cb   : > { %2246 = vmatpush3.msra.mxu1 %v1565_v48  ;;  %2203 = vmatprep.subr.mxu0 %v1564_v49 }
 0x2cc   : > { %2247 = vmatprep.subr.mxu1 %v1564_v49  ;;  %2204 = vmatpush3.msra.mxu0 %v1564_v49 }
 0x2cd   : > { %2248 = vmatpush3.msra.mxu1 %v1564_v49  ;;  %2205 = vmatprep.subr.mxu0 %v1563_v50 }
 0x2ce   : > { %2249 = vmatprep.subr.mxu1 %v1563_v50  ;;  %2206 = vmatpush3.msra.mxu0 %v1563_v50 }
 0x2cf   : > { %2250 = vmatpush3.msra.mxu1 %v1563_v50 }
 0x369   : > { %v2121_v52 = vpop.f32.mrf.mxu0 }
 0x36a   : > { %v1038_v53 = vadd.f32 %v2121_v52, %v1562_v51  ;;  %v2165_v54 = vpop.f32.mrf.mxu1 }
 0x36b   : > { %v1032_v55 = vpop.f32.mrf.mxu0  ;;  %v1143_v56 = vadd.f32 %v2165_v54, %v1562_v51 }
 0x36c   : > { %v1033_v57 = vadd.f32 %v1562_v51, %v1032_v55  ;;  %v1137_v58 = vpop.f32.mrf.mxu1  ;;  %2367 = vtanh.f32 %v1038_v53 }
 0x36d   : > { %v1138_v59 = vadd.f32 %v1562_v51, %v1137_v58  ;;  %v2124_v60 = vpop.f32.mrf.mxu0 }
 0x36e   : > { %2369 = vtanh.f32 %v1033_v57  ;;  %v1048_v61 = vadd.f32 %v2124_v60, %v1562_v51  ;;  %v2168_v62 = vpop.f32.mrf.mxu1 }
 0x36f   : > { %2371 = vtanh.f32 %v1138_v59  ;;  %v1042_v63 = vpop.f32.mrf.mxu0  ;;  %v1153_v0 = vadd.f32 %v2168_v62, %v1562_v51 }
 0x370   : > { %2373 = vtanh.f32 %v1143_v56  ;;  %v1043_v1 = vadd.f32 %v1562_v51, %v1042_v63  ;;  %v1147_v2 = vpop.f32.mrf.mxu1 }
 0x371   : > { %2375 = vtanh.f32 %v1048_v61  ;;  %v1148_v3 = vadd.f32 %v1562_v51, %v1147_v2  ;;  %v2127_v4 = vpop.f32.mrf.mxu0 }
 0x372   : > { %2377 = vtanh.f32 %v1043_v1  ;;  %v1058_v5 = vadd.f32 %v2127_v4, %v1562_v51  ;;  %v2171_v6 = vpop.f32.mrf.mxu1 }
 0x373   : > { %2379 = vtanh.f32 %v1148_v3  ;;  %v1052_v7 = vpop.f32.mrf.mxu0  ;;  %v1163_v8 = vadd.f32 %v2171_v6, %v1562_v51 }
 0x374   : > { %2381 = vtanh.f32 %v1153_v0  ;;  %v1053_v9 = vadd.f32 %v1562_v51, %v1052_v7  ;;  %v1157_v10 = vpop.f32.mrf.mxu1 }
 0x375   : > { %2383 = vtanh.f32 %v1058_v5  ;;  %v1158_v11 = vadd.f32 %v1562_v51, %v1157_v10  ;;  %v2130_v12 = vpop.f32.mrf.mxu0 }
 0x376   : > { %2385 = vtanh.f32 %v1053_v9  ;;  %v1068_v13 = vadd.f32 %v2130_v12, %v1562_v51  ;;  %v2174_v14 = vpop.f32.mrf.mxu1 }
 0x377   : > { %2387 = vtanh.f32 %v1158_v11  ;;  %v1062_v15 = vpop.f32.mrf.mxu0  ;;  %v1173_v16 = vadd.f32 %v2174_v14, %v1562_v51 }
 0x378   : > { %2389 = vtanh.f32 %v1163_v8  ;;  %v1063_v17 = vadd.f32 %v1562_v51, %v1062_v15  ;;  %v1167_v18 = vpop.f32.mrf.mxu1 }
 0x379   : > { %2391 = vtanh.f32 %v1068_v13  ;;  %v1168_v19 = vadd.f32 %v1562_v51, %v1167_v18  ;;  %v2368_v20 = vpop.eup %2367 }
 0x37a   : > { %2393 = vtanh.f32 %v1063_v17 }
 0x37b   : > { %v2370_v21 = vpop.eup %2369  ;;  %2395 = vtanh.f32 %v1168_v19 }
 0x37c   : > { %v2372_v22 = vpop.eup %2371  ;;  %2397 = vtanh.f32 %v1173_v16  ;;  %2207 = vmatprep.mubr.f32.mxu0 %v2370_v21 }
 0x37d   : > { %v2374_v23 = vpop.eup %2373  ;;  %2251 = vmatprep.mubr.f32.mxu1 %v2372_v22  ;;  %2208 = vmatmul.mubr.f32.vlgmr.msra.gmra.mxu0 %v2368_v20 }
 0x37e   : > { %v2376_v24 = vpop.eup %2375  ;;  %2252 = vmatmul.mubr.f32.vlgmr.msra.gmra.mxu1 %v2374_v23 }
 0x37f   : > { %v2378_v25 = vpop.eup %2377 }
 0x380   : > { %v2380_v26 = vpop.eup %2379  ;;  %2210 = vmatprep.mubr.f32.mxu0 %v2378_v25 }
 0x381   : > { %v2382_v27 = vpop.eup %2381  ;;  %2254 = vmatprep.mubr.f32.mxu1 %v2380_v26  ;;  %2211 = vmatmul.mubr.f32.gmra.mxu0 %v2376_v24 }
 0x382   : > { %v2384_v28 = vpop.eup %2383  ;;  %2255 = vmatmul.mubr.f32.gmra.mxu1 %v2382_v27 }
 0x383   : > { %v2386_v29 = vpop.eup %2385 }
 0x384   : > { %v2388_v30 = vpop.eup %2387  ;;  %2213 = vmatprep.mubr.f32.mxu0 %v2386_v29 }
 0x385   : > { %v2390_v31 = vpop.eup %2389  ;;  %2257 = vmatprep.mubr.f32.mxu1 %v2388_v30  ;;  %2214 = vmatmul.mubr.f32.gmra.mxu0 %v2384_v28 }
 0x386   : > { %v2392_v32 = vpop.eup %2391  ;;  %2258 = vmatmul.mubr.f32.gmra.mxu1 %v2390_v31 }
 0x387   : > { %v2394_v33 = vpop.eup %2393 }
 0x388   : > { %v2396_v34 = vpop.eup %2395  ;;  %2216 = vmatprep.mubr.f32.mxu0 %v2394_v33 }
 0x389   : > { %v2398_v35 = vpop.eup %2397  ;;  %2260 = vmatprep.mubr.f32.mxu1 %v2396_v34  ;;  %2217 = vmatmul.mubr.f32.gmra.mxu0 %v2392_v32 }
 0x38a   : > { %2261 = vmatmul.mubr.f32.gmra.mxu1 %v2398_v35 }
 0x43d   : > { %v2209_v37 = vpop.f32.mrf.mxu0 }
 0x43e   : > { %v1289_v38 = vadd.f32 %v2209_v37, %v1580_v36  ;;  %v2253_v39 = vpop.f32.mrf.mxu1 }
 0x43f   : > { %v1394_v40 = vadd.f32 %v2253_v39, %v1580_v36  ;;  %v1283_v41 = vpop.f32.mrf.mxu0 }
 0x440   : > { %1428 = vst [vmem:[%s2741_s21 + $0x8] sm:$0xff] %v1289_v38  ;;  %v1284_v42 = vadd.f32 %v1580_v36, %v1283_v41  ;;  %v1388_v43 = vpop.f32.mrf.mxu1 }
 0x441   : > { %1436 = vst [vmem:[%s2741_s21 + $0x48] sm:$0xff] %v1394_v40  ;;  %v1389_v44 = vadd.f32 %v1580_v36, %v1388_v43  ;;  %v2212_v45 = vpop.f32.mrf.mxu0 }
 0x442   : > { %1427 = vst [vmem:[%s2741_s21] sm:$0xff] %v1284_v42  ;;  %v1299_v46 = vadd.f32 %v2212_v45, %v1580_v36  ;;  %v2256_v47 = vpop.f32.mrf.mxu1 }
 0x443   : > { %1435 = vst [vmem:[%s2741_s21 + $0x40] sm:$0xff] %v1389_v44  ;;  %v1404_v48 = vadd.f32 %v2256_v47, %v1580_v36  ;;  %v1293_v49 = vpop.f32.mrf.mxu0 }
 0x444   : > { %1430 = vst [vmem:[%s2741_s21 + $0x18] sm:$0xff] %v1299_v46  ;;  %v1294_v50 = vadd.f32 %v1580_v36, %v1293_v49  ;;  %v1398_v51 = vpop.f32.mrf.mxu1 }
 0x445   : > { %1438 = vst [vmem:[%s2741_s21 + $0x58] sm:$0xff] %v1404_v48  ;;  %v1399_v52 = vadd.f32 %v1580_v36, %v1398_v51  ;;  %v2215_v53 = vpop.f32.mrf.mxu0 }
 0x446   : > { %1429 = vst [vmem:[%s2741_s21 + $0x10] sm:$0xff] %v1294_v50  ;;  %v1309_v54 = vadd.f32 %v2215_v53, %v1580_v36  ;;  %v2259_v55 = vpop.f32.mrf.mxu1 }
 0x447   : > { %1437 = vst [vmem:[%s2741_s21 + $0x50] sm:$0xff] %v1399_v52  ;;  %v1414_v56 = vadd.f32 %v2259_v55, %v1580_v36  ;;  %v1303_v57 = vpop.f32.mrf.mxu0 }
 0x448   : > { %1432 = vst [vmem:[%s2741_s21 + $0x28] sm:$0xff] %v1309_v54  ;;  %v1304_v58 = vadd.f32 %v1580_v36, %v1303_v57  ;;  %v1408_v59 = vpop.f32.mrf.mxu1 }
 0x449   : > { %1440 = vst [vmem:[%s2741_s21 + $0x68] sm:$0xff] %v1414_v56  ;;  %v1409_v60 = vadd.f32 %v1580_v36, %v1408_v59  ;;  %v2218_v61 = vpop.f32.mrf.mxu0 }
 0x44a   : > { %1431 = vst [vmem:[%s2741_s21 + $0x20] sm:$0xff] %v1304_v58  ;;  %v1319_v62 = vadd.f32 %v2218_v61, %v1580_v36  ;;  %v2262_v63 = vpop.f32.mrf.mxu1 }
 0x44b   : > { %1439 = vst [vmem:[%s2741_s21 + $0x60] sm:$0xff] %v1409_v60  ;;  %v1424_v0 = vadd.f32 %v2262_v63, %v1580_v36  ;;  %v1313_v1 = vpop.f32.mrf.mxu0 }
 0x44c   : > { %1434 = vst [vmem:[%s2741_s21 + $0x38] sm:$0xff] %v1319_v62  ;;  %v1314_v2 = vadd.f32 %v1580_v36, %v1313_v1  ;;  %v1418_v3 = vpop.f32.mrf.mxu1 }
 0x44d   : > { %1442 = vst [vmem:[%s2741_s21 + $0x78] sm:$0xff] %v1424_v0  ;;  %v1419_v4 = vadd.f32 %v1580_v36, %v1418_v3 }
 0x44e   : > { %1433 = vst [vmem:[%s2741_s21 + $0x30] sm:$0xff] %v1314_v2 }
 0x44f   : > { %1441 = vst [vmem:[%s2741_s21 + $0x70] sm:$0xff] %v1419_v4 }
 0x450 PF: > { %s13_s12 = sadd.s32 1, %s2405_s12  }
 0x451   : > { %p10_p4 = scmp.ge.s32.totalorder %s13_s12, 4  }
 0x453   :  { %12 = sbr.rel (!%p10_p4) target bundleno = 1 (0x1), region = 70 }

</bundles_post_ra>
